<compile_context>
chip_gen: v7x
topology: tpu7x:2x2x1
jax: 0.10.0
libtpu: 0.0.40
codegen_flags: <defaults>
</compile_context>

<pallas_src>
import functools

import jax
import jax.numpy as jnp
from jax.experimental import pallas as pl
from jax.experimental.pallas import tpu as pltpu


def _kl_div_kernel(pre_ref, label_ref, out_ref, *, tb, td, B, D,
                   mask_rows, mask_cols):
    """One (tb, td) tile per grid step; steps are fully independent ("parallel").

    Writes a lane-dense (1, 1, td) partial-sum row (reduced over the sublane /
    batch axis only); the cross-tile sum and the /B happen in the wrapper, so
    there is no loop-carried scalar RMW and no masked (1,1) stores.
    """
    pre = pre_ref[...].astype(jnp.float32)
    lab = label_ref[...].astype(jnp.float32)

    # PyTorch kl_div pointwise rule: label * (log(label) - pre), 0 where label <= 0.
    # The guard is load-bearing: log(0) -> -inf lives only in the unselected branch.
    keep = lab > 0

    # Ragged edges: the last batch / feature tile may overhang B / D; the
    # overhang region holds unspecified data, so mask it to contribute exactly 0.
    # (Static Python flags: the compare/select only exists when actually needed.)
    if mask_rows:
        row = jax.lax.broadcasted_iota(jnp.int32, (tb, td), 0) + pl.program_id(0) * tb
        keep = keep & (row < B)
    if mask_cols:
        col = jax.lax.broadcasted_iota(jnp.int32, (tb, td), 1) + pl.program_id(1) * td
        keep = keep & (col < D)

    term = jnp.where(keep, lab * (jnp.log(lab) - pre), 0.0)

    # Reduce only over the batch (sublane) axis -> lane-dense partial-sum row.
    out_ref[...] = jnp.sum(term, axis=0)[None, None, :]


def _choose_tiles(B, D, in_itemsize, target_block_bytes):
    """Pick (tb, td) so each input block is ~target_block_bytes (1-4 MiB is the
    measured HBM-streaming sweet spot on v5e/v6e/v7x) and the grid has >= 2
    steps whenever the problem is big enough to split (v7x has 2 TensorCores)."""
    # Feature (lane) tile: multiple of 128, or the full (short) D.
    if D < 128:
        td = D
    else:
        tb_hint = B if B <= 8 else min((B // 8) * 8, 256)
        max_lanes = max(128, target_block_bytes // max(1, tb_hint * in_itemsize))
        td = min((D // 128) * 128, (max_lanes // 128) * 128)
    # Batch (sublane) tile: multiple of 8, or the full (short) B; sized so that
    # tb * td * itemsize ~= target_block_bytes regardless of how large B is.
    if B <= 8:
        tb = B
    else:
        rows = max(8, target_block_bytes // max(1, td * in_itemsize))
        tb = max(8, min((B // 8) * 8, (rows // 8) * 8))
    nb, nd = pl.cdiv(B, tb), pl.cdiv(D, td)
    # Guarantee >= 2 grid steps when possible so both v7x TCs get work.
    if nb * nd < 2:
        if td >= 256:
            td = max(128, ((td // 2) // 128) * 128)
        elif tb >= 16:
            tb = max(8, ((tb // 2) // 8) * 8)
        nb, nd = pl.cdiv(B, tb), pl.cdiv(D, td)
    return tb, td, nb, nd


def kl_loss(pre, label, *, target_block_bytes=2 << 20):
    """sum(label * (log(label) - pre)) / B, matching F.kl_div(..., 'batchmean').

    Pass inputs in their native dtype (do NOT pre-cast bf16 to f32 in the
    caller): the kernel is HBM-bandwidth bound and upcasts per-block internally.
    """
    assert pre.shape == label.shape and pre.ndim == 2
    B, D = pre.shape

    pre_isz = jnp.dtype(pre.dtype).itemsize
    lab_isz = jnp.dtype(label.dtype).itemsize
    in_itemsize = max(pre_isz, lab_isz)

    tb, td, nb, nd = _choose_tiles(B, D, in_itemsize, target_block_bytes)
    mask_rows = (B % tb) != 0
    mask_cols = (D % td) != 0
    num_blocks = nb * nd

    kernel = functools.partial(
        _kl_div_kernel, tb=tb, td=td, B=B, D=D,
        mask_rows=mask_rows, mask_cols=mask_cols)

    # In-flight VMEM: 2 pipeline buffers per input block + tiny output buffers.
    bytes_per_step = tb * td * (pre_isz + lab_isz)
    inflight = 2 * bytes_per_step + 2 * td * 4
    vmem_limit_bytes = int(min(40 << 20, max(16 << 20, 4 * inflight)))

    total_bytes = B * D * (pre_isz + lab_isz) + num_blocks * td * 4

    partials = pl.pallas_call(
        kernel,
        out_shape=jax.ShapeDtypeStruct((num_blocks, 1, td), jnp.float32),
        grid_spec=pltpu.PrefetchScalarGridSpec(
            num_scalar_prefetch=0,
            grid=(nb, nd),
            in_specs=[
                # TODO(synk): if profiling shows exposed DMA in a many-small-block
                # regime, add pipeline_mode=pl.Buffered(3) to these two specs.
                pl.BlockSpec((tb, td), lambda i, j: (i, j)),
                pl.BlockSpec((tb, td), lambda i, j: (i, j)),
            ],
            out_specs=pl.BlockSpec((1, 1, td), lambda i, j: (i * nd + j, 0, 0)),
        ),
        compiler_params=pltpu.CompilerParams(
            # Every grid step writes its own output block -> both axes are safe
            # to shard across TensorCores (v7x megacore); harmless on v5e/v6e.
            dimension_semantics=("parallel", "parallel"),
            vmem_limit_bytes=vmem_limit_bytes,
        ),
        cost_estimate=pl.CostEstimate(
            flops=5 * B * D, transcendentals=B * D, bytes_accessed=total_bytes),
    )(pre, label)

    # Final tiny reduction + 'batchmean' divide in plain JAX (num_blocks * td floats).
    total = jnp.sum(partials) / jnp.float32(B)
    return total.astype(jnp.promote_types(pre.dtype, label.dtype))


def kl_loss_reference(pre, label):
    B = pre.shape[0]
    p = pre.astype(jnp.float32)
    l = label.astype(jnp.float32)
    term = jnp.where(l > 0, l * (jnp.log(l) - p), 0.0)
    return jnp.sum(term) / B


if __name__ == "__main__":
    key = jax.random.PRNGKey(0)
    k1, k2, k3, k4 = jax.random.split(key, 4)

    # (batch, num_classes) log-probs / probs, consistent with KLLoss usage.
    B, D = 8, 320
    pre = jax.nn.log_softmax(jax.random.normal(k1, (B, D), dtype=jnp.float32), axis=-1)
    label = jax.nn.softmax(jax.random.normal(k2, (B, D), dtype=jnp.float32), axis=-1)

    out = jax.block_until_ready(kl_loss(pre, label))
    ref = kl_loss_reference(pre, label)
    assert jnp.allclose(out, ref, rtol=1e-5, atol=1e-6), (out, ref)

    # Ragged batch AND ragged feature tiles (exercises both in-kernel edge masks;
    # no jnp.pad anywhere).
    B2, D2 = 12, 320
    pre2 = jax.nn.log_softmax(jax.random.normal(k3, (B2, D2), dtype=jnp.float32), axis=-1)
    label2 = jax.nn.softmax(jax.random.normal(k4, (B2, D2), dtype=jnp.float32), axis=-1)
    out2 = jax.block_until_ready(kl_loss(pre2, label2))
    ref2 = kl_loss_reference(pre2, label2)
    assert jnp.allclose(out2, ref2, rtol=1e-5, atol=1e-6), (out2, ref2)

    print("KERNEL_OK")
</pallas_src>

<mosaic_0001>
module attributes {stable_mosaic.version = 11 : i64} {
  func.func @_kl_div_kernel(%arg0: i32, %arg1: i32, %arg2: memref<8x256xf32, #tpu.memory_space<vmem>>, %arg3: memref<8x256xf32, #tpu.memory_space<vmem>>, %arg4: memref<1x1x256xf32, #tpu.memory_space<vmem>>) attributes {dimension_semantics = [#tpu.dimension_semantics<parallel>, #tpu.dimension_semantics<parallel>], iteration_bounds = array<i64: 1, 2>, scalar_prefetch = 0 : i64, scratch_operands = 0 : i64, tpu.core_type = #tpu.core_type<tc>, window_params = [{transform_indices = @transform_0, window_bounds = array<i64: 8, 256>}, {transform_indices = @transform_1, window_bounds = array<i64: 8, 256>}, {transform_indices = @transform_2, window_bounds = array<i64: 1, 1, 256>}]} {
    %c0 = arith.constant 0 : index
    %c0_0 = arith.constant 0 : index
    %0 = vector.load %arg2[%c0, %c0_0] : memref<8x256xf32, #tpu.memory_space<vmem>>, vector<8x256xf32>
    %c0_1 = arith.constant 0 : index
    %c0_2 = arith.constant 0 : index
    %1 = vector.load %arg3[%c0_1, %c0_2] : memref<8x256xf32, #tpu.memory_space<vmem>>, vector<8x256xf32>
    %cst = arith.constant 0.000000e+00 : f32
    %2 = vector.broadcast %cst : f32 to vector<8x256xf32>
    %3 = arith.cmpf ogt, %1, %2 : vector<8x256xf32>
    %4 = tpu.iota {dimensions = array<i32: 1>} : vector<8x256xi32>
    %c256_i32 = arith.constant 256 : i32
    %5 = arith.muli %arg1, %c256_i32 : i32
    %6 = vector.broadcast %5 : i32 to vector<8x256xi32>
    %7 = arith.addi %4, %6 : vector<8x256xi32>
    %c320_i32 = arith.constant 320 : i32
    %8 = vector.broadcast %c320_i32 : i32 to vector<8x256xi32>
    %9 = arith.cmpi slt, %7, %8 : vector<8x256xi32>
    %10 = arith.andi %3, %9 : vector<8x256xi1>
    %11 = math.log %1 : vector<8x256xf32>
    %12 = arith.subf %11, %0 : vector<8x256xf32>
    %13 = arith.mulf %1, %12 : vector<8x256xf32>
    %cst_3 = arith.constant 0.000000e+00 : f32
    %14 = vector.broadcast %cst_3 : f32 to vector<8x256xf32>
    %15 = arith.select %10, %13, %14 : vector<8x256xi1>, vector<8x256xf32>
    %cst_4 = arith.constant dense<0.000000e+00> : vector<256xf32>
    %16 = vector.multi_reduction <add>, %15, %cst_4 [0] : vector<8x256xf32> to vector<256xf32>
    %17 = vector.shape_cast %16 : vector<256xf32> to vector<1x1x256xf32>
    %c0_5 = arith.constant 0 : index
    %c0_6 = arith.constant 0 : index
    %c0_7 = arith.constant 0 : index
    %18 = vector.load %arg4[%c0_5, %c0_6, %c0_7] : memref<1x1x256xf32, #tpu.memory_space<vmem>>, vector<1x1x256xf32>
    tpu.vector_store %arg4[%c0_5, %c0_6, %c0_7], %17 {strides = array<i32>} : memref<1x1x256xf32, #tpu.memory_space<vmem>>, vector<1x1x256xf32>,
    return
  }
  func.func @transform_0(%arg0: i32, %arg1: i32) -> (i32, i32) {
    %c0_i32 = arith.constant 0 : i32
    return %arg0, %arg1 : i32, i32
  }
  func.func @transform_1(%arg0: i32, %arg1: i32) -> (i32, i32) {
    %c0_i32 = arith.constant 0 : i32
    return %arg0, %arg1 : i32, i32
  }
  func.func @transform_2(%arg0: i32, %arg1: i32) -> (i32, i32, i32) {
    %c2_i32 = arith.constant 2 : i32
    %0 = arith.muli %arg0, %c2_i32 : i32
    %1 = arith.addi %0, %arg1 : i32
    %c0_i32 = arith.constant 0 : i32
    %c0_i32_0 = arith.constant 0 : i32
    %c0_i32_1 = arith.constant 0 : i32
    return %1, %c0_i32, %c0_i32_0 : i32, i32, i32
  }
}

</mosaic_0001>

<bundles_post_ra>
// kernel: tpu_custom_call.1
= control target key start
LH: loop header
LB: loop body
LE: loop exit
PB: predicated region body
PF: predicated region fallthrough
CT: control target
= control target key end

     0   :  { %7 = vsyncpa [#allocation3], 0  ;;  %s902_s0 = inlined_call_operand.hbm [shape: f32[8,320], index: 0, kind: input, shape index: {}]   ;;  %s903_s1 = inlined_call_operand.hbm [shape: f32[8,320], index: 1, kind: input, shape index: {}]   ;;  %s904_s2 = inlined_call_operand.hbm [shape: f32[2,1,256], index: 2, kind: output, shape index: {}]  }
   0x1   :  { %9 = vsyncpa [#allocation3 + $0x1], 0 }
   0x2   :  { %10 = vsyncpa [#allocation6], 0 }
   0x3   :  { %12 = vsyncpa [#allocation6 + $0x1], 0 }
   0x4   :  { %13 = vsyncpa [#allocation4], 0 }
   0x5   :  { %15 = vsyncpa [#allocation4 + $0x1], 0  ;;  %s690_s9 = smov 0   ;;  %s692_s10 = smov 0  }
   0x6   :  { %s694_s11 = smov 0   ;;  %s696_s12 = smov 0  }
   0x7   :  { %s698_s13 = smov 0   ;;  %s700_s14 = smov 0  }
   0x8 LB: > { %s434_s15 = sadd.s32 4294967295, %s669_s14   ;;  %s435_s16 = sadd.s32 4294967294, %s669_s14   ;;  %s669_s14 = sphi %s700_s14, %s21_s14   ;;  %s665_s13 = sphi %s698_s13, %s922_s13   ;;  %s661_s12 = sphi %s696_s12, %s921_s12   ;;  %s657_s11 = sphi %s694_s11, %s920_s11   ;;  %s653_s10 = sphi %s692_s10, %s919_s10   ;;  %s649_s9 = sphi %s690_s9, %s918_s9  }
   0x9   : > { %s30_s17 = sadd.s32 1, %s665_s13  ;;  %s42_s18 = sadd.s32 1, %s657_s11 }
   0xa   : > { %p31_p0 = scmp.ge.s32.totalorder %s30_s17, 2  ;;  %p49_p1 = scmp.ne.s32.totalorder %s657_s11, %s653_s10 }
   0xb   : > { %p50_p2 = scmp.eq.s32.totalorder %s669_s14, 0  ;;  %p55_p3 = scmp.ne.s32.totalorder %s653_s10, %s649_s9 }
   0xc   : > { %s924_s17 = smov (%p31_p0, %s30_s17), 0  ;;  %p56_p5 = scmp.eq.s32.totalorder %s434_s15, 0 }
   0xd   : > { %p731_p4 = por %p50_p2, %p49_p1  ;;  %s38_s20 = ssub.s32 %s665_s13, %s924_s17 }
   0xe   : > { %p111_p6 = scmp.eq.s32.totalorder %s434_s15, 1  ;;  %p40_p7 = scmp.eq.s32.totalorder %s38_s20, 0 }
   0xf   : > { %s909_s19 = scalar_select %p731_p4, 1, 0 }
  0x10   : > { %p737_p8 = por %p56_p5, %p55_p3  ;;  %p741_p9 = por %p111_p6, %p49_p1 }
  0x11   : > { %p117_p10 = scmp.eq.s32.totalorder %s435_s16, 1  ;;  %p905_p12 = scmp.ge.s32.totalorder %s669_s14, 2 }
  0x12   : > { %s910_s21 = scalar_select %p737_p8, 1, 0 }
  0x13   : > { %s911_s22 = scalar_select %p741_p9, 1, 0 }
  0x14   : > { %s746_s23 = scalar_select %p40_p7, %s657_s11, %s42_s18  }
  0x15   : > { %p748_p11 = por %p117_p10, %p55_p3  ;;  %133 = sbr.rel (%p905_p12) target bundleno = 98 (0x62), region = 16 }
  0x17   : > { %s912_s24 = scalar_select %p748_p11, 1, 0 }
  0x1c   : > { %136 = sbr.rel (!%p731_p4) target bundleno = 62 (0x3e), region = 20  ;;  %s137_s25 = sand.u32 (%p731_p4), 1, %s657_s11  }
  0x1d   : > { %s439_s26 = sshll.u32 (%p731_p4), %s665_s13, 1  ;;  %s438_s27 = sshll.u32 (%p731_p4), %s137_s25, 4 }
  0x1e   : > { %s143_s28 = ssub.s32 (%p731_p4), 3, %s439_s26  ;;  %s762_s3 = scalar_lea.sflag (%p731_p4), [#allocation3], %s137_s25 }
  0x1f   : > { %p144_p13 = scmp.lt.s32.totalorder (%p731_p4), %s143_s28, 2  ;;  %s141_s4 = scalar_lea.vmem (%p731_p4), [#allocation2], %s438_s27 }
  0x23   : > { %s926_s28 = smov (!%p144_p13, %s143_s28), 2 }
  0x24   : > { %s759_s29 = sshll.u32 %s926_s28, 7 }
  0x25   : > { %s148_s30 = ssub.s32 256, %s759_s29 }
  0x26   : > { %149 = vsyncadd %s762_s3, %s148_s30  ;;  %p441_p0 = scmp.ne.s32.totalorder %s759_s29, 0  ;;  %s462_s5 = sshll.u32 %s665_s13, 8 }
  0x27   : > { %s770_s8 = scalar_lea.hbm %s902_s0, %s462_s5  ;;  %s157_s15 = sshll.u32 %s141_s4, 4  ;;  %s158_s15 = int_to_ptr.vmem [resolvable:$true] %s157_s15 }
  0x28   : > { %s527_s16 = scalar_lea.hbm %s770_s8, %s759_s29  ;;  %s531_s25 = scalar_lea.hbm %s902_s0, 384 }
  0x29   : > { %p528_p1 = scmp.ne.s32.totalorder %s770_s8, %s527_s16  ;;  %p532_p5 = scmp.lt.u32.totalorder %s770_s8, %s902_s0 }
  0x2a   : > { %p533_p6 = scmp.lt.u32.totalorder %s531_s25, %s527_s16  ;;  %p535_p10 = scmp.lt.u32.totalorder %s527_s16, %s770_s8 }
  0x2b   : > { %p529_p2 = pnand %p528_p1, %p441_p0 }
  0x2c   : > { %p534_p7 = por %p533_p6, %p532_p5 }
  0x2d   : > { %p530_p3 = pneg %p529_p2 }
  0x2e   : > { %p536_p13 = por %p535_p10, %p534_p7 }
  0x30   : > { %p537_p12 = pnand %p536_p13, %p530_p3 }
  0x32   : > { %540 = shalt.err (!%p537_p12)
}
  0x33   : > { %s541_s28 = scalar_lea.vmem %s158_s15, %s759_s29  ;;  %s671_s30 = smov [#allocation2]  }
  0x34   : > { %p542_p11 = scmp.ne.s32.totalorder %s158_s15, %s541_s28  ;;  %s545_s4 = sshll.u32 %s671_s30, 4  ;;  %s546_s4 = int_to_ptr.vmem [resolvable:$false] %s545_s4 }
  0x35   : > { %s547_s5 = scalar_lea.vmem %s546_s4, 512  ;;  %p548_p9 = scmp.lt.s32.totalorder %s158_s15, %s546_s4 }
  0x36   : > { %p543_p1 = pnand %p542_p11, %p441_p0  ;;  %p549_p8 = scmp.lt.s32.totalorder %s547_s5, %s541_s28 }
  0x38   : > { %p544_p2 = pneg %p543_p1  ;;  %p550_p4 = por %p549_p8, %p548_p9 }
  0x3a   : > { %p551_p5 = pnand %p550_p4, %p544_p2 }
  0x3c   : > { %554 = shalt.err (!%p551_p5)
}
  0x3d   : > { %160 = dma.hbm_to_vmem [thread:$0]  (%p441_p0), %s770_s8, %s759_s29, %s158_s15, %s762_s3  }
  0x3e PF: > { %p913_p12 = scmp.ne.s32.totalorder %s909_s19, 0 }
  0x3f   : > { %s164_s6 = sand.u32 (%p913_p12), 1, %s657_s11   ;;  %s446_s7 = sshll.u32 (%p913_p12), %s665_s13, 1 }
  0x40   : > { %163 = sbr.rel (!%p913_p12) target bundleno = 98 (0x62), region = 24  ;;  %s445_s16 = sshll.u32 (%p913_p12), %s164_s6, 4 }
  0x41   : > { %s170_s18 = ssub.s32 (%p913_p12), 3, %s446_s7  ;;  %s800_s26 = scalar_lea.sflag (%p913_p12), [#allocation6], %s164_s6 }
  0x42   : > { %p171_p11 = scmp.lt.s32.totalorder (%p913_p12), %s170_s18, 2  ;;  %s168_s29 = scalar_lea.vmem (%p913_p12), [#allocation5], %s445_s16 }
  0x47   : > { %s928_s18 = smov (!%p171_p11, %s170_s18), 2 }
  0x48   : > { %s797_s20 = sshll.u32 %s928_s18, 7 }
  0x49   : > { %s175_s25 = ssub.s32 256, %s797_s20 }
  0x4a   : > { %176 = vsyncadd %s800_s26, %s175_s25  ;;  %p448_p4 = scmp.ne.s32.totalorder %s797_s20, 0  ;;  %s463_s19 = sshll.u32 %s665_s13, 8 }
  0x4b   : > { %s808_s15 = scalar_lea.hbm %s903_s1, %s463_s19  ;;  %s184_s27 = sshll.u32 %s168_s29, 4  ;;  %s185_s27 = int_to_ptr.vmem [resolvable:$true] %s184_s27 }
  0x4c   : > { %s555_s28 = scalar_lea.hbm %s808_s15, %s797_s20  ;;  %s559_s5 = scalar_lea.hbm %s903_s1, 384 }
  0x4d   : > { %p556_p8 = scmp.ne.s32.totalorder %s808_s15, %s555_s28  ;;  %p560_p3 = scmp.lt.u32.totalorder %s808_s15, %s903_s1 }
  0x4e   : > { %p561_p6 = scmp.lt.u32.totalorder %s559_s5, %s555_s28  ;;  %p563_p10 = scmp.lt.u32.totalorder %s555_s28, %s808_s15 }
  0x4f   : > { %p557_p9 = pnand %p556_p8, %p448_p4 }
  0x50   : > { %p562_p7 = por %p561_p6, %p560_p3 }
  0x51   : > { %p558_p0 = pneg %p557_p9 }
  0x52   : > { %p564_p13 = por %p563_p10, %p562_p7 }
  0x54   : > { %p565_p1 = pnand %p564_p13, %p558_p0 }
  0x56   : > { %568 = shalt.err (!%p565_p1)
}
  0x57   : > { %s569_s16 = scalar_lea.vmem %s185_s27, %s797_s20  ;;  %s672_s18 = smov [#allocation5]  }
  0x58   : > { %p570_p2 = scmp.ne.s32.totalorder %s185_s27, %s569_s16  ;;  %s573_s25 = sshll.u32 %s672_s18, 4  ;;  %s574_s25 = int_to_ptr.vmem [resolvable:$false] %s573_s25 }
  0x59   : > { %s575_s29 = scalar_lea.vmem %s574_s25, 512  ;;  %p576_p11 = scmp.lt.s32.totalorder %s185_s27, %s574_s25 }
  0x5a   : > { %p571_p5 = pnand %p570_p2, %p448_p4  ;;  %p577_p8 = scmp.lt.s32.totalorder %s575_s29, %s569_s16 }
  0x5c   : > { %p572_p12 = pneg %p571_p5  ;;  %p578_p9 = por %p577_p8, %p576_p11 }
  0x5e   : > { %p579_p3 = pnand %p578_p9, %p572_p12 }
  0x60   : > { %582 = shalt.err (!%p579_p3)
}
  0x61   : > { %187 = dma.hbm_to_vmem [thread:$0]  (%p448_p4), %s808_s15, %s797_s20, %s185_s27, %s800_s26  }
  0x62 PF: > { %p452_p0 = scmp.ge.s32.totalorder %s669_s14, 1  ;;  %p189_p6 = scmp.lt.s32.totalorder %s669_s14, 3 }
  0x64   : > { %p190_p7 = pnand %p452_p0, %p189_p6 }
  0x65   : > { %s834_s19 = sand.u32 (!%p190_p7), 1, %s653_s10   ;;  %p914_p10 = scmp.ne.s32.totalorder (!%p190_p7), %s910_s21, 0 }
  0x66   : > { %193 = sbr.rel (%p190_p7) target bundleno = 164 (0xa4), region = 28  ;;  %s453_s3 = sshll.u32 (!%p190_p7), %s834_s19, 4 }
  0x67   : > { %s196_s8 = scalar_lea.sflag (!%p190_p7), [#allocation3], %s834_s19  ;;  %s199_s28 = scalar_lea.vmem (!%p190_p7), [#allocation2], %s453_s3 }
  0x6d   : > { %636 = dma.done.wait (%p914_p10), %s196_s8, 256  }
  0x6e   : > { %638 = vsyncadd (%p914_p10), %s196_s8, 4294967040  ;;  %s205_s20 = scalar_lea.sflag [#allocation6], %s834_s19  ;;  %s208_s26 = scalar_lea.vmem [#allocation5], %s453_s3 }
  0x6f   : > { %640 = dma.done.wait (%p914_p10), %s205_s20, 256  }
  0x70   : > { %642 = vsyncadd (%p914_p10), %s205_s20, 4294967040  ;;  %v252_v0 = vlaneseq  ;;  %v248_v1 = vld [vmem:[%s208_s26] sm:$0xff]  ;;  %v249_v2 = vld [vmem:[%s208_s26 + $0x8] sm:$0xff]  ;;  %s456_s15 = sshll.u32 %s661_s12, 8  ;;  %v673_v24 = vmov 1966171168  }
  0x71   : > { %523 = vlog2.f32 %v248_v1  ;;  %v256_v5 = vstv %s456_s15  ;;  %v246_v9 = vld [vmem:[%s199_s28] sm:$0xff]  ;;  %v247_v11 = vld [vmem:[%s199_s28 + $0x8] sm:$0xff]  ;;  %vm250_vm0 = vcmp.gt.f32.partialorder %v248_v1, 0.0  ;;  %vm251_vm2 = vcmp.gt.f32.partialorder %v249_v2, 0.0  ;;  %s455_s21 = sshll.u32 %s834_s19, 1  ;;  %s464_s4 = sshll.u32 %s661_s12, 5 }
  0x72   : > { %v253_v3 = vand.u32 127, %v252_v0  ;;  %525 = vlog2.f32 %v249_v2  ;;  %v289_v25 = vunpack.c.l.s4 %v673_v24  ;;  %v292_v31 = vshrl.u32 %v252_v0, 7  ;;  %s233_s27 = scalar_lea.vmem [#allocation7], %s455_s21  ;;  %s855_s7 = scalar_lea.hbm %s904_s2, %s464_s4 }
  0x73   : > { %s325_s30 = sshll.u32 %s233_s27, 4  ;;  %vm305_vm6 = vcmp.lt.s32.totalorder %v252_v0, 256  ;;  %s309_s16 = scalar_lea.sflag [#allocation4], %s834_s19  ;;  %s850_s30 = int_to_ptr.vmem [resolvable:$true] %s325_s30 }
  0x74   : > { %v254_v4 = vadd.s32 128, %v253_v3  ;;  %v257_v6 = vadd.s32 %v256_v5, %v253_v3  ;;  %v290_v30 = vunpack.c.0.s8 %v289_v25  ;;  %s583_s18 = scalar_lea.vmem %s850_s30, 32  ;;  %p915_p13 = scmp.ne.s32.totalorder %s911_s22, 0 }
  0x75   : > { %p584_p4 = scmp.ne.s32.totalorder %s850_s30, %s583_s18  ;;  %s674_s12 = smov [#allocation7]  }
  0x76   : > { %v258_v7 = vadd.s32 %v256_v5, %v254_v4  ;;  %vm259_vm1 = vcmp.lt.s32.totalorder %v257_v6, 320  ;;  %v293_v36 = vsub.s32 %v290_v30, %v292_v31  ;;  %s587_s25 = sshll.u32 %s674_s12, 4  ;;  %s588_s25 = int_to_ptr.vmem [resolvable:$false] %s587_s25 }
  0x77   : > { %vm261_vm4 = vmand %vm250_vm0, %vm259_vm1  ;;  %p585_p1 = pnand %p584_p4, %p915_p13  ;;  %s589_s29 = scalar_lea.vmem %s588_s25, 64 }
  0x78   : > { %vm260_vm3 = vcmp.lt.s32.totalorder %v258_v7, 320  ;;  %p590_p5 = scmp.lt.s32.totalorder %s850_s30, %s588_s25  ;;  %p591_p12 = scmp.lt.s32.totalorder %s589_s29, %s583_s18 }
  0x79   : > { %vm262_vm5 = vmand %vm251_vm2, %vm260_vm3  ;;  %p586_p2 = pneg %p585_p1 }
  0x7a   : > { %p592_p11 = por %p591_p12, %p590_p5 }
  0x7b   : > { %v524_v8 = vpop.eup %523 }
  0x7c   : > { %v526_v10 = vpop.eup %525  ;;  %v264_v12 = vmul.f32 0.6931472, %v524_v8  ;;  %p593_p8 = pnand %p592_p11, %p586_p2 }
  0x7d   : > { %v266_v13 = vmul.f32 0.6931472, %v526_v10 }
  0x7e   : > { %v267_v14 = vsub.f32 %v264_v12, %v246_v9 }
  0x7f   : > { %v268_v15 = vsub.f32 %v266_v13, %v247_v11 }
  0x80   : > { %v269_v16 = vmul.f32 %v267_v14, %v248_v1 }
  0x81   : > { %v270_v17 = vmul.f32 %v268_v15, %v249_v2 }
  0x82   : > { %v271_v18 = vsel %vm261_vm4, %v269_v16, 0.0 }
  0x83   : > { %v272_v19 = vsel %vm262_vm5, %v270_v17, 0.0  ;;  %v273_v20 = vrot.slane %v271_v18, 4 }
  0x84   : > { %v279_v21 = vrot.slane %v272_v19, 4 }
  0x85   : > { %v274_v22 = vadd.f32 %v273_v20, %v271_v18 }
  0x86   : > { %v280_v23 = vadd.f32 %v279_v21, %v272_v19 }
  0x87   : > { %v275_v26 = vrot.slane %v274_v22, 2 }
  0x88   : > { %v281_v27 = vrot.slane %v280_v23, 2 }
  0x89   : > { %v276_v28 = vadd.f32 %v275_v26, %v274_v22 }
  0x8a   : > { %v282_v29 = vadd.f32 %v281_v27, %v280_v23 }
  0x8b   : > { %v277_v32 = vrot.slane %v276_v28, 1 }
  0x8c   : > { %v283_v33 = vrot.slane %v282_v29, 1 }
  0x8d   : > { %v278_v34 = vadd.f32 %v277_v32, %v276_v28 }
  0x8e   : > { %v284_v35 = vadd.f32 %v283_v33, %v282_v29 }
  0x90   : > { %v287_v37 = vcombine.low %v278_v34, %v284_v35 }
  0x92   : > { %v294_v38 = vrot.slane %v287_v37, %v293_v36 }
  0x94   : > { %v301_v39 = vrot.slane %v294_v38, %v293_v36 }
  0x96   : > { %307 = vst.msk [vmem:[%s233_s27] sm:$0x3] %vm305_vm6, %v301_v39 }
  0x97   : > { %596 = shalt.err (!%p593_p8)
}
  0x98   : > { %s597_s19 = scalar_lea.hbm %s855_s7, 32  ;;  %s601_s28 = scalar_lea.hbm %s904_s2, 64 }
  0x99   : > { %p598_p9 = scmp.ne.s32.totalorder %s855_s7, %s597_s19  ;;  %p602_p6 = scmp.lt.u32.totalorder %s855_s7, %s904_s2 }
  0x9a   : > { %p603_p7 = scmp.lt.u32.totalorder %s601_s28, %s597_s19  ;;  %p605_p4 = scmp.lt.u32.totalorder %s597_s19, %s855_s7 }
  0x9b   : > { %p599_p3 = pnand %p598_p9, %p915_p13 }
  0x9c   : > { %p604_p10 = por %p603_p7, %p602_p6 }
  0x9d   : > { %p600_p0 = pneg %p599_p3 }
  0x9e   : > { %p606_p1 = por %p605_p4, %p604_p10 }
  0xa0   : > { %p607_p2 = pnand %p606_p1, %p600_p0 }
  0xa2   : > { %610 = shalt.err (!%p607_p2)
}
  0xa3   : > { %467 = dma.vmem_to_hbm [thread:$0]  (%p915_p13), %s850_s30, 32, %s855_s7, %s309_s16  }
  0xa4 PF: > { %s337_s15 = sand.u32 1, %s649_s9   ;;  %p916_p5 = scmp.ne.s32.totalorder %s912_s24, 0 }
  0xa5   : > { %p917_p12 = scmp.ge.s32.totalorder %s669_s14, 2  ;;  %s338_s21 = scalar_lea.sflag [#allocation4], %s337_s15 }
  0xa7   : > { %p470_p11 = pnand %p917_p12, %p916_p5 }
  0xa9   : > { %644 = dma.done.wait (!%p470_p11), %s338_s21, 32  }
  0xaa   : > { %646 = vsyncadd (!%p470_p11), %s338_s21, 4294967264  ;;  %s21_s14 = sadd.s32 1, %s669_s14   ;;  %s918_s9 = smov %s653_s10 }
  0xab   : > { %p18_p8 = scmp.ge.s32.totalorder %s21_s14, 4   ;;  %s919_s10 = smov %s657_s11 }
  0xac   : > { %s920_s11 = smov %s746_s23  ;;  %s921_s12 = smov %s665_s13 }
  0xad   : > { %s922_s13 = smov %s924_s17  ;;  %20 = sbr.rel (!%p18_p8) target bundleno = 8 (0x8), region = 86 }
  0xb4   :  { %343 = vsyncpa [#allocation3], 1 }
  0xb5   :  { %345 = vsyncpa [#allocation3 + $0x1], 1 }
  0xb6   :  { %346 = vsyncpa [#allocation6], 1 }
  0xb7   :  { %348 = vsyncpa [#allocation6 + $0x1], 1 }
  0xb8   :  { %349 = vsyncpa [#allocation4], 1 }
  0xb9   :  { %351 = vsyncpa [#allocation4 + $0x1], 1 }

</bundles_post_ra>
